<compile_context>
chip_gen: v7x
topology: tpu7x:2x2x1
jax: 0.10.0
libtpu: 0.0.40
codegen_flags: <defaults>
</compile_context>

<pallas_src>
import functools
import math

import jax
import jax.numpy as jnp
from jax.experimental import pallas as pl
from jax.experimental.pallas import tpu as pltpu


# ---------------------------------------------------------------------------
# Kernels
# ---------------------------------------------------------------------------
def _pe_add_kernel(x_ref, pe_ref, o_ref):
    # Eval-mode forward: dropout is identity.  pe block (TILE_S, 1, D)
    # broadcasts over the batch axis of the (TILE_S, B, D) x block.
    o_ref[...] = (x_ref[...] + pe_ref[...]).astype(o_ref.dtype)


def _pe_add_dropout_kernel(x_ref, pe_ref, bits_ref, o_ref, *, threshold,
                           inv_keep):
    # Training-mode forward: (x + pe) then inverted dropout.
    # keep iff bits >= threshold  ->  P(keep) = 1 - p (bits uniform uint32).
    y = x_ref[...] + pe_ref[...]
    keep = bits_ref[...] >= jnp.uint32(threshold)
    o_ref[...] = jnp.where(keep, y * inv_keep, 0).astype(o_ref.dtype)


# ---------------------------------------------------------------------------
# Parameter / buffer setup (module __init__)
# ---------------------------------------------------------------------------
def make_sinusoidal_pe(d_model, max_len=5000, dtype=jnp.float32):
    position = jnp.arange(max_len, dtype=jnp.float32)[:, None]          # (L, 1)
    div_term = jnp.exp(
        jnp.arange(0, d_model, 2, dtype=jnp.float32)
        * (-math.log(10000.0) / d_model)
    )                                                                    # (D/2,)
    ang = position * div_term                                            # (L, D/2)
    pe = jnp.zeros((max_len, d_model), jnp.float32)
    pe = pe.at[:, 0::2].set(jnp.sin(ang))
    pe = pe.at[:, 1::2].set(jnp.cos(ang))
    # unsqueeze(0).transpose(0,1) -> (max_len, 1, d_model)
    return pe[:, None, :].astype(dtype)


# ---------------------------------------------------------------------------
# Tiling helper
# ---------------------------------------------------------------------------
def _pick_tile_s(S, B, D, itemsize, n_big_streams,
                 vmem_budget_bytes=8 << 20):
    """Largest TILE_S whose double-buffered streams fit a conservative budget.

    Budget of 8 MiB keeps all (n_big_streams x double-buffered) blocks well
    under v5e's 16 MiB default scoped VMEM and v7x's 64 MiB physical VMEM,
    while being large enough to approach the HBM roofline.
    """
    bytes_per_row = n_big_streams * B * D * itemsize * 2  # x2 double buffer
    tile = max(1, vmem_budget_bytes // max(1, bytes_per_row))
    if tile >= 8:
        tile = (tile // 8) * 8      # sublane-friendly
    return int(min(S, tile))


# ---------------------------------------------------------------------------
# Wrapper (module forward)
# ---------------------------------------------------------------------------
def sinusoidal_positional_encoding(x, pe, *, dropout_p=0.1, training=False,
                                   rng_key=None):
    S, B, D = x.shape
    pe_slice = pe[:S].astype(x.dtype)  # (S, 1, D), match x dtype (no in-kernel cast)
    # NOTE: for production shapes keep D a multiple of 128 so stores are
    # lane-dense (unmasked vst); the demo shapes below are intentionally tiny.

    compiler_params = None
    if jax.default_backend() == "tpu":
        compiler_params = pltpu.CompilerParams(
            dimension_semantics=("parallel",))

    if (not training) or dropout_p <= 0.0:
        tile_s = _pick_tile_s(S, B, D, x.dtype.itemsize, n_big_streams=2)
        return pl.pallas_call(
            _pe_add_kernel,
            out_shape=jax.ShapeDtypeStruct((S, B, D), x.dtype),
            grid=(pl.cdiv(S, tile_s),),
            in_specs=[
                pl.BlockSpec((tile_s, B, D), lambda i: (i, 0, 0)),
                pl.BlockSpec((tile_s, 1, D), lambda i: (i, 0, 0)),
            ],
            out_specs=pl.BlockSpec((tile_s, B, D), lambda i: (i, 0, 0)),
            compiler_params=compiler_params,
        )(x, pe_slice)

    if dropout_p >= 1.0:
        return jnp.zeros_like(x)

    if rng_key is None:
        rng_key = jax.random.PRNGKey(0)
    # One uint32 per element, tiled with the same BlockSpec as x, so every
    # grid step sees its own slice of randomness (no duplicated masks).
    # TODO(synk): switch to pltpu.prng_seed/prng_random_bits (per-tile seed =
    # seed + pl.program_id(0)) once interpret-mode support isn't required —
    # that removes the extra HBM read of the bits stream.
    bits = jax.random.bits(rng_key, (S, B, D), dtype=jnp.uint32)

    threshold = min(int(round(dropout_p * (2 ** 32))), 2 ** 32 - 1)
    inv_keep = 1.0 / (1.0 - dropout_p)
    kernel = functools.partial(_pe_add_dropout_kernel, threshold=threshold,
                               inv_keep=inv_keep)

    tile_s = _pick_tile_s(S, B, D, x.dtype.itemsize, n_big_streams=3)
    return pl.pallas_call(
        kernel,
        out_shape=jax.ShapeDtypeStruct((S, B, D), x.dtype),
        grid=(pl.cdiv(S, tile_s),),
        in_specs=[
            pl.BlockSpec((tile_s, B, D), lambda i: (i, 0, 0)),
            pl.BlockSpec((tile_s, 1, D), lambda i: (i, 0, 0)),
            pl.BlockSpec((tile_s, B, D), lambda i: (i, 0, 0)),
        ],
        out_specs=pl.BlockSpec((tile_s, B, D), lambda i: (i, 0, 0)),
        compiler_params=compiler_params,
    )(x, pe_slice, bits)


# ---------------------------------------------------------------------------
# Demo
# ---------------------------------------------------------------------------
if __name__ == "__main__":
    d_model = 32
    seq_len = 8
    batch = 2
    dropout_p = 0.1

    key = jax.random.PRNGKey(0)
    kx, kd = jax.random.split(key)
    x = jax.random.normal(kx, (seq_len, batch, d_model), dtype=jnp.float32)

    pe = make_sinusoidal_pe(d_model, max_len=5000)
    ref = x + pe[:seq_len]  # broadcast (S,1,D) over batch

    # Eval mode (dropout = identity): must match the reference exactly.
    out_eval = jax.block_until_ready(
        sinusoidal_positional_encoding(x, pe, dropout_p=dropout_p,
                                       training=False))
    assert out_eval.shape == x.shape and out_eval.dtype == x.dtype
    assert jnp.allclose(out_eval, ref, atol=1e-6, rtol=1e-6), "eval mismatch"

    # Training mode: inverted dropout; mask is a deterministic function of the
    # passed-in key, so we can rebuild the exact expected output here.
    out_train = jax.block_until_ready(
        sinusoidal_positional_encoding(x, pe, dropout_p=dropout_p,
                                       training=True, rng_key=kd))
    bits_ref = jax.random.bits(kd, x.shape, dtype=jnp.uint32)
    thr = jnp.uint32(min(int(round(dropout_p * (2 ** 32))), 2 ** 32 - 1))
    expect = jnp.where(bits_ref >= thr, ref / (1.0 - dropout_p), 0.0)
    assert out_train.shape == x.shape and out_train.dtype == x.dtype
    assert jnp.allclose(out_train, expect, atol=1e-5, rtol=1e-5), \
        "train mismatch"

    print("KERNEL_OK")
</pallas_src>

<mosaic_0001>
module attributes {stable_mosaic.version = 11 : i64} {
  func.func @_pe_add_kernel(%arg0: i32, %arg1: memref<8x2x32xf32, #tpu.memory_space<vmem>>, %arg2: memref<8x1x32xf32, #tpu.memory_space<vmem>>, %arg3: memref<8x2x32xf32, #tpu.memory_space<vmem>>) attributes {dimension_semantics = [#tpu.dimension_semantics<arbitrary>], iteration_bounds = array<i64: 1>, scalar_prefetch = 0 : i64, scratch_operands = 0 : i64, tpu.core_type = #tpu.core_type<tc>, window_params = [{transform_indices = @transform_0, window_bounds = array<i64: 8, 2, 32>}, {transform_indices = @transform_1, window_bounds = array<i64: 8, 1, 32>}, {transform_indices = @transform_2, window_bounds = array<i64: 8, 2, 32>}]} {
    %c0 = arith.constant 0 : index
    %c0_0 = arith.constant 0 : index
    %c0_1 = arith.constant 0 : index
    %0 = vector.load %arg1[%c0, %c0_0, %c0_1] : memref<8x2x32xf32, #tpu.memory_space<vmem>>, vector<8x2x32xf32>
    %c0_2 = arith.constant 0 : index
    %c0_3 = arith.constant 0 : index
    %c0_4 = arith.constant 0 : index
    %1 = vector.load %arg2[%c0_2, %c0_3, %c0_4] : memref<8x1x32xf32, #tpu.memory_space<vmem>>, vector<8x1x32xf32>
    %2 = vector.broadcast %1 : vector<8x1x32xf32> to vector<8x2x32xf32>
    %3 = arith.addf %0, %2 : vector<8x2x32xf32>
    %c0_5 = arith.constant 0 : index
    %c0_6 = arith.constant 0 : index
    %c0_7 = arith.constant 0 : index
    %4 = vector.load %arg3[%c0_5, %c0_6, %c0_7] : memref<8x2x32xf32, #tpu.memory_space<vmem>>, vector<8x2x32xf32>
    tpu.vector_store %arg3[%c0_5, %c0_6, %c0_7], %3 {strides = array<i32>} : memref<8x2x32xf32, #tpu.memory_space<vmem>>, vector<8x2x32xf32>,
    return
  }
  func.func @transform_0(%arg0: i32) -> (i32, i32, i32) {
    %c0_i32 = arith.constant 0 : i32
    %c0_i32_0 = arith.constant 0 : i32
    %c0_i32_1 = arith.constant 0 : i32
    return %arg0, %c0_i32, %c0_i32_0 : i32, i32, i32
  }
  func.func @transform_1(%arg0: i32) -> (i32, i32, i32) {
    %c0_i32 = arith.constant 0 : i32
    %c0_i32_0 = arith.constant 0 : i32
    %c0_i32_1 = arith.constant 0 : i32
    return %arg0, %c0_i32, %c0_i32_0 : i32, i32, i32
  }
  func.func @transform_2(%arg0: i32) -> (i32, i32, i32) {
    %c0_i32 = arith.constant 0 : i32
    %c0_i32_0 = arith.constant 0 : i32
    %c0_i32_1 = arith.constant 0 : i32
    return %arg0, %c0_i32, %c0_i32_0 : i32, i32, i32
  }
}

</mosaic_0001>

<bundles_post_ra>
// kernel: tpu_custom_call.1
= control target key start
LH: loop header
LB: loop body
LE: loop exit
PB: predicated region body
PF: predicated region fallthrough
CT: control target
= control target key end

     0   :  { %7 = vsyncpa [#allocation3], 0  ;;  %s301_s0 = inlined_call_operand.hbm [shape: f32[8,2,32], index: 0, kind: input, shape index: {}]   ;;  %s302_s1 = inlined_call_operand.hbm [shape: f32[8,1,32], index: 1, kind: input, shape index: {}]   ;;  %s303_s2 = inlined_call_operand.hbm [shape: f32[8,2,32], index: 2, kind: output, shape index: {}]  }
   0x1   :  { %8 = vsyncpa [#allocation6], 0 }
   0x2   :  { %9 = vsyncpa [#allocation4], 0  ;;  %s226_s9 = smov [#allocation2]   ;;  %s154_s13 = scalar_lea.hbm %s301_s0, 256 }
   0x3   :  { %s15_s10 = sshll.u32 %s226_s9, 4  ;;  %p155_p0 = scmp.ne.s32.totalorder %s301_s0, %s154_s13  ;;  %s16_s10 = int_to_ptr.vmem [resolvable:$true] %s15_s10 }
   0x4   :  { %p158_p1 = scmp.lt.u32.totalorder %s154_s13, %s301_s0 }
   0x6   :  { %p160_p2 = pnand %p158_p1, %p155_p0 }
   0x8   :  { %163 = shalt.err (!%p160_p2)
}
   0x9   :  { %s164_s18 = scalar_lea.vmem %s16_s10, 256  ;;  %p169_p4 = scmp.lt.s32.totalorder %s16_s10, %s16_s10 }
   0xa   :  { %p165_p3 = scmp.ne.s32.totalorder %s16_s10, %s164_s18  ;;  %p170_p5 = scmp.lt.s32.totalorder %s164_s18, %s164_s18 }
   0xc   :  { %p171_p6 = por %p170_p5, %p169_p4 }
   0xe   :  { %p172_p7 = pnand %p171_p6, %p165_p3 }
  0x10   :  { %175 = shalt.err (!%p172_p7)
}
  0x11   :  { %s227_s19 = smov 32   ;;  %s228_s20 = smov 2  }
  0x12   :  { %21 = dma.hbm_to_vmem [thread:$0]  %s301_s0, 256, %s16_s10, [#allocation3], %s227_s19, %s227_s19, %s228_s20  }
  0x13   :  { %s229_s23 = smov [#allocation5]   ;;  %s176_s27 = scalar_lea.hbm %s302_s1, 128 }
  0x14   :  { %s27_s24 = sshll.u32 %s229_s23, 4  ;;  %p177_p8 = scmp.ne.s32.totalorder %s302_s1, %s176_s27  ;;  %s28_s24 = int_to_ptr.vmem [resolvable:$true] %s27_s24 }
  0x15   :  { %p180_p9 = scmp.lt.u32.totalorder %s176_s27, %s302_s1 }
  0x17   :  { %p182_p10 = pnand %p180_p9, %p177_p8 }
  0x19   :  { %185 = shalt.err (!%p182_p10)
}
  0x1a   :  { %s186_s4 = scalar_lea.vmem %s28_s24, 128  ;;  %p191_p12 = scmp.lt.s32.totalorder %s28_s24, %s28_s24 }
  0x1b   :  { %p187_p11 = scmp.ne.s32.totalorder %s28_s24, %s186_s4  ;;  %p192_p13 = scmp.lt.s32.totalorder %s186_s4, %s186_s4 }
  0x1d   :  { %p193_p0 = por %p192_p13, %p191_p12 }
  0x1f   :  { %p194_p1 = pnand %p193_p0, %p187_p11 }
  0x21   :  { %197 = shalt.err (!%p194_p1)
}
  0x22   :  { %s230_s0 = smov 16   ;;  %s231_s5 = smov 1  }
  0x23   :  { %33 = dma.hbm_to_vmem [thread:$0]  %s302_s1, 128, %s28_s24, [#allocation6], %s230_s0, %s230_s0, %s231_s5  }
  0x24   :  { %220 = dma.done.wait [#allocation3], 256  }
  0x25   :  { %221 = vsyncadd [#allocation3], 4294967040 }
  0x26   :  { %222 = dma.done.wait [#allocation6], 128  }
  0x27   :  { %223 = vsyncadd [#allocation6], 4294967168  ;;  %vm112_vm0 = vcmask 254976   ;;  %s232_s8 = smov [#allocation7]   ;;  %v40_v0 = vld [vmem:[#allocation2] sm:$0x3] }
  0x28   :  { %s275_s9 = sshll.u32 %s232_s8, 4  ;;  %v139_v1 = vld [vmem:[#allocation5] ss:$0 sm:$0xff]  ;;  %v41_v2 = vld [vmem:[#allocation2 + $0x2] sm:$0x3]  ;;  %s127_s9 = int_to_ptr.vmem [resolvable:$true] %s275_s9 }
  0x29   :  { %v104_v3 = vadd.f32 %v139_v1, %v40_v0  ;;  %v140_v4 = vld [vmem:[#allocation5 + $0x1] ss:$0 sm:$0xff]  ;;  %v42_v5 = vld [vmem:[#allocation2 + $0x4] sm:$0x3]  ;;  %v141_v6 = vld [vmem:[#allocation5 + $0x2] ss:$0 sm:$0xff]  ;;  %p203_p3 = scmp.lt.s32.totalorder %s127_s9, %s127_s9 }
  0x2a   :  { %v105_v7 = vadd.f32 %v140_v4, %v41_v2  ;;  %v106_v8 = vadd.f32 %v141_v6, %v42_v5  ;;  %v43_v9 = vld [vmem:[#allocation2 + $0x6] sm:$0x3]  ;;  %v142_v10 = vld [vmem:[#allocation5 + $0x3] ss:$0 sm:$0xff]  ;;  %v44_v11 = vld [vmem:[#allocation2 + $0x8] sm:$0x3] }
  0x2b   :  { %113 = vst.msk [vmem:[#allocation7] sm:$0x3] %vm112_vm0, %v104_v3  ;;  %v107_v12 = vadd.f32 %v142_v10, %v43_v9  ;;  %v143_v13 = vld [vmem:[#allocation5 + $0x4] ss:$0 sm:$0xff]  ;;  %v45_v14 = vld [vmem:[#allocation2 + $0xa] sm:$0x3] }
  0x2c   :  { %v144_v15 = vld [vmem:[#allocation5 + $0x5] ss:$0 sm:$0xff]  ;;  %114 = vst.msk [vmem:[#allocation7 + $0x2] sm:$0x3] %vm112_vm0, %v105_v7  ;;  %115 = vst.msk [vmem:[#allocation7 + $0x4] sm:$0x3] %vm112_vm0, %v106_v8  ;;  %v108_v16 = vadd.f32 %v143_v13, %v44_v11 }
  0x2d   :  { %v109_v17 = vadd.f32 %v144_v15, %v45_v14  ;;  %v46_v18 = vld [vmem:[#allocation2 + $0xc] sm:$0x3]  ;;  %v145_v19 = vld [vmem:[#allocation5 + $0x6] ss:$0 sm:$0xff]  ;;  %v47_v20 = vld [vmem:[#allocation2 + $0xe] sm:$0x3] }
  0x2e   :  { %116 = vst.msk [vmem:[#allocation7 + $0x6] sm:$0x3] %vm112_vm0, %v107_v12  ;;  %v110_v21 = vadd.f32 %v145_v19, %v46_v18  ;;  %v146_v22 = vld [vmem:[#allocation5 + $0x7] ss:$0 sm:$0xff]  ;;  %117 = vst.msk [vmem:[#allocation7 + $0x8] sm:$0x3] %vm112_vm0, %v108_v16 }
  0x2f   :  { %118 = vst.msk [vmem:[#allocation7 + $0xa] sm:$0x3] %vm112_vm0, %v109_v17  ;;  %v111_v23 = vadd.f32 %v146_v22, %v47_v20  ;;  %s198_s1 = scalar_lea.vmem %s127_s9, 256 }
  0x30   :  { %119 = vst.msk [vmem:[#allocation7 + $0xc] sm:$0x3] %vm112_vm0, %v110_v21  ;;  %p199_p2 = scmp.ne.s32.totalorder %s127_s9, %s198_s1  ;;  %p204_p4 = scmp.lt.s32.totalorder %s198_s1, %s198_s1 }
  0x31   :  { %120 = vst.msk [vmem:[#allocation7 + $0xe] sm:$0x3] %vm112_vm0, %v111_v23 }
  0x32   :  { %p205_p5 = por %p204_p4, %p203_p3 }
  0x34   :  { %p206_p6 = pnand %p205_p5, %p199_p2 }
  0x36   :  { %209 = shalt.err (!%p206_p6)
}
  0x37   :  { %s210_s12 = scalar_lea.hbm %s303_s2, 256 }
  0x38   :  { %p211_p7 = scmp.ne.s32.totalorder %s303_s2, %s210_s12  ;;  %p214_p8 = scmp.lt.u32.totalorder %s210_s12, %s303_s2 }
  0x3a   :  { %p216_p9 = pnand %p214_p8, %p211_p7 }
  0x3c   :  { %219 = shalt.err (!%p216_p9)
}
  0x3d   :  { %132 = dma.vmem_to_hbm [thread:$0]  %s127_s9, 256, %s303_s2, [#allocation4], %s227_s19, %s227_s19, %s228_s20  }
  0x3e   :  { %224 = dma.done.wait [#allocation4], 256  }
  0x3f   :  { %225 = vsyncadd [#allocation4], 4294967040 }
  0x40   :  { %136 = vsyncpa [#allocation3], 1 }
  0x41   :  { %137 = vsyncpa [#allocation6], 1 }
  0x42   :  { %138 = vsyncpa [#allocation4], 1 }

</bundles_post_ra>
